<compile_context>
chip_gen: v7x
topology: tpu7x:2x2x1
jax: 0.10.0
libtpu: 0.0.40
codegen_flags: <defaults>
</compile_context>

<pallas_src>
import jax
import jax.numpy as jnp
from jax import lax
from jax.experimental import pallas as pl
from jax.experimental.pallas import tpu as pltpu


def _cdiv(a, b):
    return (a + b - 1) // b


def _round_up(a, b):
    return _cdiv(a, b) * b


# Tile caps: lane dims multiples of 128, sublane multiples of 8.  Worst case
# (fused posterior, f32 operands, 2-deep buffering): x 8 MiB + W 8 MiB +
# eps_W 8 MiB + out 2 MiB + acc 1 MiB ~= 27 MiB, inside the 48 MiB v7x budget.
_TM_CAP = 512
_TN_CAP = 512
_TK_CAP = 2048

# Fused path streams W and eps_W grid_i times (2*grid_i weight passes);
# materializing W_var costs ~3 passes + grid_i reads -> breakeven ~ grid_i 3-4.
_MATERIALIZE_MIN_I_TILES = 4


def _fit_tile(dim, cap, align):
    """Pick a tile <= cap with minimal padding.

    dim <= cap -> full-extent block (always legal, no padding at all).
    dim  > cap -> smallest tile count; tile rounded up to `align`
                  (pads by < align per tile instead of up to ~2x the dim).
    """
    if dim <= cap:
        return dim, dim
    n = _cdiv(dim, cap)
    t = _round_up(_cdiv(dim, n), align)
    return t, n * t


def _vmem_limit_bytes():
    try:
        info = pltpu.get_tpu_info()
        phys = int(getattr(info, "vmem_capacity_bytes", 64 * 1024 * 1024))
    except Exception:  # info query unavailable -> assume smallest (v7x) VMEM
        phys = 64 * 1024 * 1024
    # ~75% of physical (48 MiB on v7x, 96 MiB on v5e/v6e), capped at 100 MiB.
    return max(32 * 1024 * 1024, min(3 * phys // 4, 100 * 1024 * 1024))


def _make_kernel(fused, direct_out):
    """NT matmul step: acc += x(tm,tk) . w(tn,tk)^T (contract on K).

    fused      -> perturb the weight tile in-VMEM with softplus(sigma) * eps.
    direct_out -> f32 output: accumulate straight into the resident o_ref.
    """

    def _step(x_ref, w_ref, eps_ref, sp_ref, b_ref, o_ref, acc_ref):
        k = pl.program_id(2)

        @pl.when(k == 0)
        def _():
            acc_ref[...] = jnp.zeros_like(acc_ref)

        if fused:
            sp = sp_ref[0]
            # Perturb in f32 (exact vs the f32 reference, and avoids bf16 VPU
            # work on v5e), cast once to the MXU input dtype.
            w = (w_ref[...].astype(jnp.float32)
                 + sp * eps_ref[...].astype(jnp.float32)).astype(w_ref.dtype)
        else:
            w = w_ref[...]

        acc_ref[...] += lax.dot_general(
            x_ref[...], w,
            dimension_numbers=(((1,), (1,)), ((), ())),
            preferred_element_type=jnp.float32)

        @pl.when(k == pl.num_programs(2) - 1)
        def _():
            # bias row is f32; added exactly once.
            o_ref[...] = (acc_ref[...].astype(jnp.float32)
                          + b_ref[...]).astype(o_ref.dtype)

    if fused and direct_out:
        def kernel(sp_ref, x_ref, w_ref, eps_ref, b_ref, o_ref):
            _step(x_ref, w_ref, eps_ref, sp_ref, b_ref, o_ref, o_ref)
    elif fused:
        def kernel(sp_ref, x_ref, w_ref, eps_ref, b_ref, o_ref, acc_ref):
            _step(x_ref, w_ref, eps_ref, sp_ref, b_ref, o_ref, acc_ref)
    elif direct_out:
        def kernel(x_ref, w_ref, b_ref, o_ref):
            _step(x_ref, w_ref, None, None, b_ref, o_ref, o_ref)
    else:
        def kernel(x_ref, w_ref, b_ref, o_ref, acc_ref):
            _step(x_ref, w_ref, None, None, b_ref, o_ref, acc_ref)
    return kernel


def _tiled_call(kernel, inputs, in_specs, Mp, Np, Kp, tm, tn, tk,
                out_dtype, bytes_accessed, direct_out):
    grid = (Mp // tm, Np // tn, Kp // tk)
    scratch = [] if direct_out else [pltpu.VMEM((tm, tn), jnp.float32)]
    return pl.pallas_call(
        kernel,
        out_shape=jax.ShapeDtypeStruct((Mp, Np), out_dtype),
        grid_spec=pltpu.PrefetchScalarGridSpec(
            num_scalar_prefetch=0,
            grid=grid,
            in_specs=in_specs,
            out_specs=pl.BlockSpec((tm, tn), lambda i, j, k: (i, j)),
            scratch_shapes=scratch),
        compiler_params=pltpu.CompilerParams(
            dimension_semantics=("parallel", "parallel", "arbitrary"),
            vmem_limit_bytes=_vmem_limit_bytes()),
        cost_estimate=pl.CostEstimate(
            flops=2 * Mp * Np * Kp,
            transcendentals=0,
            bytes_accessed=int(bytes_accessed)),
    )(*inputs)


def variational_linear(x, weight, bias, sigma_param, eps_w, eps_b,
                       use_posterior=True, training=False,
                       materialize_weights=None):
    """Mirrors VariationalLinear.forward.

    eps_w / eps_b are the standard-normal draws (torch.randn_like stand-ins)
    supplied by the caller so the forward pass is deterministic / verifiable.
    materialize_weights: None = auto (materialize W_var when the weight panel
    is revisited >= 4 times, or when sigma is not a scalar); True/False = force.
    """
    N, K = weight.shape
    orig_shape = x.shape
    out_dtype = x.dtype
    x2 = x.reshape(-1, K)
    M = x2.shape[0]

    posterior = bool(training or use_posterior)
    direct_out = (jnp.dtype(out_dtype) == jnp.dtype(jnp.float32))

    # ---- tile plan: minimal padding, full-extent blocks when a dim fits ----
    tm, Mp = _fit_tile(M, _TM_CAP, 8)
    tn, Np = _fit_tile(N, _TN_CAP, 128)
    tk, Kp = _fit_tile(K, _TK_CAP, 128)

    # Keep >= 2 tiles on a parallel axis so both v7x TensorCores get work
    # (near-zero effect on single-TC v5e/v6e).
    if Mp // tm == 1 and Np // tn == 1 and N >= 256:
        t = (min(tn, N // 2) // 128) * 128
        while t >= 128 and N % t:
            t -= 128
        if t >= 128:
            tn, Np = t, N

    grid_i, grid_j = Mp // tm, Np // tn

    # ---- pad only when a dim exceeded its cap and is ragged ----
    if (Mp, Kp) != (M, K):
        x2 = jnp.pad(x2, ((0, Mp - M), (0, Kp - K)))

    def _pad_w(w):
        return w if (Np, Kp) == (N, K) else jnp.pad(
            w, ((0, Np - N), (0, Kp - K)))

    def _pad_b(b):  # b is a (1, N) f32 row
        return b if Np == N else jnp.pad(b, ((0, 0), (0, Np - N)))

    if bias is None:  # torch allows bias-less Linear; adding zeros is exact.
        bias = jnp.zeros((N,), weight.dtype)
        eps_b = jnp.zeros((N,), weight.dtype)

    xsz = jnp.dtype(x.dtype).itemsize
    wsz = jnp.dtype(weight.dtype).itemsize
    osz = jnp.dtype(out_dtype).itemsize

    x_spec = pl.BlockSpec((tm, tk), lambda i, j, k: (i, k))
    w_spec = pl.BlockSpec((tn, tk), lambda i, j, k: (j, k))
    b_spec = pl.BlockSpec((1, tn), lambda i, j, k: (0, j))

    if posterior:
        # Numerically stable softplus, computed once in the wrapper.
        sp = jax.nn.softplus(jnp.asarray(sigma_param, jnp.float32))
        scalar_sigma = (sp.size == 1)

        # Bias perturbation is O(N): wrapper-side, kept in f32 end-to-end.
        b_var = _pad_b((bias.astype(jnp.float32)
                        + sp * eps_b.astype(jnp.float32)).reshape(1, N))

        if materialize_weights is None:
            materialize_weights = (not scalar_sigma
                                   or grid_i >= _MATERIALIZE_MIN_I_TILES)

        if materialize_weights:
            # One XLA pass builds W_var; the plain kernel then streams it once
            # per i-tile: weight-side HBM ~ (3 + grid_i) * N*K instead of the
            # fused path's 2 * grid_i * N*K.
            w_var = _pad_w((weight.astype(jnp.float32)
                            + sp * eps_w.astype(jnp.float32)
                            ).astype(weight.dtype))
            bytes_accessed = (grid_j * Mp * Kp * xsz
                              + (grid_i + 3) * Np * Kp * wsz
                              + Np * 4 + Mp * Np * osz)
            out = _tiled_call(
                _make_kernel(fused=False, direct_out=direct_out),
                (x2, w_var, b_var), [x_spec, w_spec, b_spec],
                Mp, Np, Kp, tm, tn, tk, out_dtype, bytes_accessed, direct_out)
        else:
            # Fused path: stream W and eps_W, perturb in-VMEM on the VPU.
            # TODO(synk): for latency-critical small-M decode, eps_W could be
            # generated in-kernel (pltpu.prng_seed / prng_random_bits keyed on
            # (j, k)) to halve weight-side HBM bytes; it is streamed here so
            # the noise matches the caller-supplied eps_w exactly.
            sp_spec = pl.BlockSpec(memory_space=pltpu.MemorySpace.SMEM)
            bytes_accessed = (grid_j * Mp * Kp * xsz
                              + 2 * grid_i * Np * Kp * wsz
                              + Np * 4 + Mp * Np * osz)
            out = _tiled_call(
                _make_kernel(fused=True, direct_out=direct_out),
                (sp.reshape(1), x2, _pad_w(weight), _pad_w(eps_w), b_var),
                [sp_spec, x_spec, w_spec, w_spec, b_spec],
                Mp, Np, Kp, tm, tn, tk, out_dtype, bytes_accessed, direct_out)
    else:
        # Eval path: plain linear, no eps tensors touched at all.
        b2 = _pad_b(bias.astype(jnp.float32).reshape(1, N))
        bytes_accessed = (grid_j * Mp * Kp * xsz + grid_i * Np * Kp * wsz
                          + Np * 4 + Mp * Np * osz)
        out = _tiled_call(
            _make_kernel(fused=False, direct_out=direct_out),
            (x2, _pad_w(weight), b2), [x_spec, w_spec, b_spec],
            Mp, Np, Kp, tm, tn, tk, out_dtype, bytes_accessed, direct_out)

    out = out[:M, :N]
    return out.reshape(*orig_shape[:-1], N)


# ----------------------------- reference & demo ------------------------------

def _reference(x, weight, bias, sigma, eps_w, eps_b):
    sp = jax.nn.softplus(jnp.asarray(sigma, jnp.float32))
    w_var = weight + sp * eps_w
    b_var = bias + sp * eps_b
    return jnp.einsum("...k,nk->...n", x, w_var) + b_var


if __name__ == "__main__":
    # Small shapes: batch=2, seq=8, in_features=32, out_features=128
    B, S, K, N = 2, 8, 32, 128

    key = jax.random.PRNGKey(0)
    kx, kw, kb, kew, keb = jax.random.split(key, 5)

    x = jax.random.normal(kx, (B, S, K), dtype=jnp.float32)
    weight = jax.random.normal(kw, (N, K), dtype=jnp.float32) * 0.05
    bias = jax.random.normal(kb, (N,), dtype=jnp.float32) * 0.05
    sigma_param = jnp.float32(-2.0)

    # deterministic stand-ins for torch.randn_like (no torch RNG / checkpoint)
    eps_w = jax.random.normal(kew, (N, K), dtype=jnp.float32)
    eps_b = jax.random.normal(keb, (N,), dtype=jnp.float32)

    y_ref = _reference(x, weight, bias, sigma_param, eps_w, eps_b)

    # 1) posterior, fused kernel (small M -> eps_W streamed & perturbed in-VMEM)
    y_fused = jax.block_until_ready(
        variational_linear(x, weight, bias, sigma_param, eps_w, eps_b,
                           use_posterior=True))
    assert y_fused.shape == (B, S, N)
    assert jnp.allclose(y_fused, y_ref, atol=1e-2, rtol=1e-2)

    # 2) posterior, materialized W_var path (the large-M training plan)
    y_mat = jax.block_until_ready(
        variational_linear(x, weight, bias, sigma_param, eps_w, eps_b,
                           use_posterior=True, materialize_weights=True))
    assert jnp.allclose(y_mat, y_ref, atol=1e-2, rtol=1e-2)

    # 3) eval path: plain linear, no eps inputs touched
    y_eval = jax.block_until_ready(
        variational_linear(x, weight, bias, sigma_param, eps_w, eps_b,
                           use_posterior=False, training=False))
    y_eval_ref = jnp.einsum("...k,nk->...n", x, weight) + bias
    assert jnp.allclose(y_eval, y_eval_ref, atol=1e-2, rtol=1e-2)

    print("KERNEL_OK")
</pallas_src>

<mosaic_0001>
module attributes {stable_mosaic.version = 11 : i64} {
  func.func @kernel(%arg0: i32, %arg1: i32, %arg2: i32, %arg3: memref<1xf32, #tpu.memory_space<smem>>, %arg4: memref<16x32xf32, #tpu.memory_space<vmem>>, %arg5: memref<128x32xf32, #tpu.memory_space<vmem>>, %arg6: memref<128x32xf32, #tpu.memory_space<vmem>>, %arg7: memref<1x128xf32, #tpu.memory_space<vmem>>, %arg8: memref<16x128xf32, #tpu.memory_space<vmem>>) attributes {dimension_semantics = [#tpu.dimension_semantics<parallel>, #tpu.dimension_semantics<parallel>, #tpu.dimension_semantics<arbitrary>], iteration_bounds = array<i64: 1, 1, 1>, scalar_prefetch = 0 : i64, scratch_operands = 0 : i64, tpu.core_type = #tpu.core_type<tc>, window_params = [{transform_indices = @transform_0, window_bounds = array<i64: 1>}, {transform_indices = @transform_1, window_bounds = array<i64: 16, 32>}, {transform_indices = @transform_2, window_bounds = array<i64: 128, 32>}, {transform_indices = @transform_3, window_bounds = array<i64: 128, 32>}, {transform_indices = @transform_4, window_bounds = array<i64: 1, 128>}, {transform_indices = @transform_5, window_bounds = array<i64: 16, 128>}]} {
    %c0_i32 = arith.constant 0 : i32
    %0 = arith.cmpi eq, %arg2, %c0_i32 : i32
    %1 = arith.extui %0 : i1 to i32
    %c0_i32_0 = arith.constant 0 : i32
    %2 = arith.cmpi ne, %1, %c0_i32_0 : i32
    scf.if %2 {
      %cst_13 = arith.constant 0.000000e+00 : f32
      %17 = vector.broadcast %cst_13 : f32 to vector<16x128xf32>
      %c0_14 = arith.constant 0 : index
      %c0_15 = arith.constant 0 : index
      %18 = vector.load %arg8[%c0_14, %c0_15] : memref<16x128xf32, #tpu.memory_space<vmem>>, vector<16x128xf32>
      tpu.vector_store %arg8[%c0_14, %c0_15], %17 {strides = array<i32>} : memref<16x128xf32, #tpu.memory_space<vmem>>, vector<16x128xf32>,
    } else {
    }
    %c0 = arith.constant 0 : index
    %3 = memref.load %arg3[%c0] : memref<1xf32, #tpu.memory_space<smem>>
    %c0_1 = arith.constant 0 : index
    %c0_2 = arith.constant 0 : index
    %4 = vector.load %arg5[%c0_1, %c0_2] : memref<128x32xf32, #tpu.memory_space<vmem>>, vector<128x32xf32>
    %c0_3 = arith.constant 0 : index
    %c0_4 = arith.constant 0 : index
    %5 = vector.load %arg6[%c0_3, %c0_4] : memref<128x32xf32, #tpu.memory_space<vmem>>, vector<128x32xf32>
    %6 = vector.broadcast %3 : f32 to vector<128x32xf32>
    %7 = arith.mulf %6, %5 : vector<128x32xf32>
    %8 = arith.addf %4, %7 : vector<128x32xf32>
    %c0_5 = arith.constant 0 : index
    %c0_6 = arith.constant 0 : index
    %9 = vector.load %arg8[%c0_5, %c0_6] : memref<16x128xf32, #tpu.memory_space<vmem>>, vector<16x128xf32>
    %c0_7 = arith.constant 0 : index
    %c0_8 = arith.constant 0 : index
    %10 = vector.load %arg4[%c0_7, %c0_8] : memref<16x32xf32, #tpu.memory_space<vmem>>, vector<16x32xf32>
    %cst = arith.constant dense<0.000000e+00> : vector<16x128xf32>
    %11 = tpu.matmul %10, %8, %cst {dimension_numbers = #tpu.dot_dimension_numbers<[1], [1], [0], [0], [0, 0, 1, 0], [], []>} : vector<16x32xf32>, vector<128x32xf32>, vector<16x128xf32> -> vector<16x128xf32>
    %12 = arith.addf %9, %11 : vector<16x128xf32>
    %c0_9 = arith.constant 0 : index
    %c0_10 = arith.constant 0 : index
    %13 = vector.load %arg8[%c0_9, %c0_10] : memref<16x128xf32, #tpu.memory_space<vmem>>, vector<16x128xf32>
    tpu.vector_store %arg8[%c0_9, %c0_10], %12 {strides = array<i32>} : memref<16x128xf32, #tpu.memory_space<vmem>>, vector<16x128xf32>,
    %c0_i32_11 = arith.constant 0 : i32
    %14 = arith.cmpi eq, %arg2, %c0_i32_11 : i32
    %15 = arith.extui %14 : i1 to i32
    %c0_i32_12 = arith.constant 0 : i32
    %16 = arith.cmpi ne, %15, %c0_i32_12 : i32
    scf.if %16 {
      %c0_13 = arith.constant 0 : index
      %c0_14 = arith.constant 0 : index
      %17 = vector.load %arg8[%c0_13, %c0_14] : memref<16x128xf32, #tpu.memory_space<vmem>>, vector<16x128xf32>
      %c0_15 = arith.constant 0 : index
      %c0_16 = arith.constant 0 : index
      %18 = vector.load %arg7[%c0_15, %c0_16] : memref<1x128xf32, #tpu.memory_space<vmem>>, vector<1x128xf32>
      %19 = vector.broadcast %18 : vector<1x128xf32> to vector<16x128xf32>
      %20 = arith.addf %17, %19 : vector<16x128xf32>
      %c0_17 = arith.constant 0 : index
      %c0_18 = arith.constant 0 : index
      %21 = vector.load %arg8[%c0_17, %c0_18] : memref<16x128xf32, #tpu.memory_space<vmem>>, vector<16x128xf32>
      tpu.vector_store %arg8[%c0_17, %c0_18], %20 {strides = array<i32>} : memref<16x128xf32, #tpu.memory_space<vmem>>, vector<16x128xf32>,
    } else {
    }
    return
  }
  func.func @transform_0(%arg0: i32, %arg1: i32, %arg2: i32) -> i32 {
    %c0_i32 = arith.constant 0 : i32
    %c0_i32_0 = arith.constant 0 : i32
    return %c0_i32 : i32
  }
  func.func @transform_1(%arg0: i32, %arg1: i32, %arg2: i32) -> (i32, i32) {
    %c0_i32 = arith.constant 0 : i32
    return %arg0, %arg2 : i32, i32
  }
  func.func @transform_2(%arg0: i32, %arg1: i32, %arg2: i32) -> (i32, i32) {
    %c0_i32 = arith.constant 0 : i32
    return %arg1, %arg2 : i32, i32
  }
  func.func @transform_3(%arg0: i32, %arg1: i32, %arg2: i32) -> (i32, i32) {
    %c0_i32 = arith.constant 0 : i32
    return %arg1, %arg2 : i32, i32
  }
  func.func @transform_4(%arg0: i32, %arg1: i32, %arg2: i32) -> (i32, i32) {
    %c0_i32 = arith.constant 0 : i32
    %c0_i32_0 = arith.constant 0 : i32
    return %c0_i32, %arg1 : i32, i32
  }
  func.func @transform_5(%arg0: i32, %arg1: i32, %arg2: i32) -> (i32, i32) {
    %c0_i32 = arith.constant 0 : i32
    return %arg0, %arg1 : i32, i32
  }
}

</mosaic_0001>

<bundles_post_ra>
// kernel: tpu_custom_call.1
= control target key start
LH: loop header
LB: loop body
LE: loop exit
PB: predicated region body
PF: predicated region fallthrough
CT: control target
= control target key end

     0   :  { %vm98_vm0 = vcmask 261120   ;;  %s623_s0 = inlined_call_operand.<no memory space> [shape: f32[1], index: 0, kind: input, shape index: {}]   ;;  %s624_s1 = inlined_call_operand.vmem [shape: f32[16,32], index: 1, kind: input, shape index: {}]   ;;  %s625_s2 = inlined_call_operand.vmem [shape: f32[128,32], index: 2, kind: input, shape index: {}]   ;;  %s626_s3 = inlined_call_operand.vmem [shape: f32[128,32], index: 3, kind: input, shape index: {}]   ;;  %s627_s4 = inlined_call_operand.vmem [shape: f32[1,128], index: 4, kind: input, shape index: {}]   ;;  %s628_s5 = inlined_call_operand.hbm [shape: f32[16,128], index: 5, kind: output, shape index: {}]  }
   0x1   :  { %v29_v0 = vld [vmem:[%s625_s2] sm:$0xff]  ;;  %v454_v2 = vstv %s623_s0  ;;  %v30_v3 = vld [vmem:[%s625_s2 + $0x8] sm:$0xff]  ;;  %v31_v6 = vld [vmem:[%s625_s2 + $0x10] sm:$0xff] }
   0x2   :  { %v45_v1 = vld [vmem:[%s626_s3] sm:$0xff]  ;;  %v46_v4 = vld [vmem:[%s626_s3 + $0x8] sm:$0xff]  ;;  %v32_v8 = vld [vmem:[%s625_s2 + $0x18] sm:$0xff] }
   0x3   :  { %v62_v5 = vmul.f32 %v454_v2, %v45_v1  ;;  %v63_v7 = vmul.f32 %v454_v2, %v46_v4  ;;  %v47_v9 = vld [vmem:[%s626_s3 + $0x10] sm:$0xff]  ;;  %v48_v10 = vld [vmem:[%s626_s3 + $0x18] sm:$0xff]  ;;  %v49_v14 = vld [vmem:[%s626_s3 + $0x20] sm:$0xff] }
   0x4   :  { %v64_v12 = vmul.f32 %v454_v2, %v47_v9  ;;  %v65_v13 = vmul.f32 %v454_v2, %v48_v10  ;;  %v50_v16 = vld [vmem:[%s626_s3 + $0x28] sm:$0xff]  ;;  %vm486_vm1 = vmpackc.low %vm98_vm0, %vm98_vm0  ;;  %v66_v21 = vmul.f32 %v454_v2, %v49_v14  ;;  %v33_v24 = vld [vmem:[%s625_s2 + $0x20] sm:$0xff] }
   0x5   :  { %v78_v11 = vadd.f32 %v62_v5, %v29_v0  ;;  %v79_v15 = vadd.f32 %v63_v7, %v30_v3  ;;  %v67_v22 = vmul.f32 %v454_v2, %v50_v16  ;;  %v34_v25 = vld [vmem:[%s625_s2 + $0x28] sm:$0xff]  ;;  %v51_v28 = vld [vmem:[%s626_s3 + $0x30] sm:$0xff]  ;;  %v52_v29 = vld [vmem:[%s626_s3 + $0x38] sm:$0xff] }
   0x6   :  { %v80_v18 = vadd.f32 %v64_v12, %v31_v6  ;;  %v81_v19 = vadd.f32 %v65_v13, %v32_v8  ;;  %v82_v26 = vadd.f32 %v66_v21, %v33_v24  ;;  %v96_v30 = vld [vmem:[%s624_s1] sm:$0xff] }
   0x7   :  { %v336_v20 = vpack.c.bf16 %v79_v15, %v78_v11  ;;  %v83_v27 = vadd.f32 %v67_v22, %v34_v25 }
   0x8   :  { %v342_v23 = vpack.c.bf16 %v81_v19, %v80_v18 }
   0x9   :  { %338 = vmatprep.subr.msk.bf16.mxu0 %vm486_vm1, %v336_v20 }
   0xa   :  { %341 = vmatpush3.bf16.xpose.msk.msra.mxu0 %vm486_vm1, %v336_v20 }
   0xb   :  { %344 = vmatprep.subr.msk.bf16.mxu0 %vm486_vm1, %v342_v23 }
   0xc   :  { %11 = vsyncpa [#allocation4], 0  ;;  %333 = vmatprep.mubr.msk.f32.mxu0 %vm98_vm0, %v96_v30  ;;  %v348_v31 = vpack.c.bf16 %v83_v27, %v82_v26  ;;  %v68_v32 = vmul.f32 %v454_v2, %v51_v28  ;;  %v69_v33 = vmul.f32 %v454_v2, %v52_v29  ;;  %v35_v34 = vld [vmem:[%s625_s2 + $0x30] sm:$0xff]  ;;  %v36_v35 = vld [vmem:[%s625_s2 + $0x38] sm:$0xff]  ;;  %s412_s10 = smov [#allocation3]  }
   0xd   :  { %v53_v38 = vld [vmem:[%s626_s3 + $0x40] sm:$0xff]  ;;  %v54_v39 = vld [vmem:[%s626_s3 + $0x48] sm:$0xff]  ;;  %v55_v47 = vld [vmem:[%s626_s3 + $0x50] sm:$0xff]  ;;  %s253_s11 = sshll.u32 %s412_s10, 4  ;;  %s254_s11 = int_to_ptr.vmem [resolvable:$true] %s253_s11 }
   0xe   :  { %v84_v36 = vadd.f32 %v68_v32, %v35_v34  ;;  %v85_v37 = vadd.f32 %v69_v33, %v36_v35  ;;  %v70_v41 = vmul.f32 %v454_v2, %v53_v38  ;;  %v71_v42 = vmul.f32 %v454_v2, %v54_v39  ;;  %v37_v43 = vld [vmem:[%s625_s2 + $0x40] sm:$0xff]  ;;  %v38_v44 = vld [vmem:[%s625_s2 + $0x48] sm:$0xff]  ;;  %v56_v48 = vld [vmem:[%s626_s3 + $0x58] sm:$0xff]  ;;  %s388_s12 = scalar_lea.vmem %s254_s11, 256  ;;  %p393_p1 = scmp.lt.s32.totalorder %s254_s11, %s254_s11 }
   0xf   :  { %v72_v50 = vmul.f32 %v454_v2, %v55_v47  ;;  %v73_v51 = vmul.f32 %v454_v2, %v56_v48  ;;  %v39_v52 = vld [vmem:[%s625_s2 + $0x50] sm:$0xff]  ;;  %v40_v53 = vld [vmem:[%s625_s2 + $0x58] sm:$0xff]  ;;  %v57_v56 = vld [vmem:[%s626_s3 + $0x60] sm:$0xff]  ;;  %p389_p0 = scmp.ne.s32.totalorder %s254_s11, %s388_s12  ;;  %p394_p2 = scmp.lt.s32.totalorder %s388_s12, %s388_s12 }
  0x10   :  { %v354_v40 = vpack.c.bf16 %v85_v37, %v84_v36  ;;  %v86_v45 = vadd.f32 %v70_v41, %v37_v43  ;;  %v87_v46 = vadd.f32 %v71_v42, %v38_v44  ;;  %v58_v57 = vld [vmem:[%s626_s3 + $0x68] sm:$0xff]  ;;  %v74_v59 = vmul.f32 %v454_v2, %v57_v56  ;;  %v41_v61 = vld [vmem:[%s625_s2 + $0x60] sm:$0xff]  ;;  %v59_v1 = vld [vmem:[%s626_s3 + $0x70] sm:$0xff] }
  0x11   :  { %v88_v54 = vadd.f32 %v72_v50, %v39_v52  ;;  %v89_v55 = vadd.f32 %v73_v51, %v40_v53  ;;  %v75_v60 = vmul.f32 %v454_v2, %v58_v57  ;;  %v42_v62 = vld [vmem:[%s625_s2 + $0x68] sm:$0xff]  ;;  %v60_v3 = vld [vmem:[%s626_s3 + $0x78] sm:$0xff]  ;;  %v76_v5 = vmul.f32 %v454_v2, %v59_v1  ;;  %v43_v7 = vld [vmem:[%s625_s2 + $0x70] sm:$0xff]  ;;  %p395_p3 = por %p394_p2, %p393_p1 }
  0x12   :  { %347 = vmatpush3.bf16.xpose.msk.msra.mxu0 %vm486_vm1, %v342_v23  ;;  %v360_v49 = vpack.c.bf16 %v87_v46, %v86_v45  ;;  %v90_v63 = vadd.f32 %v74_v59, %v41_v61  ;;  %v77_v6 = vmul.f32 %v454_v2, %v60_v3  ;;  %v44_v8 = vld [vmem:[%s625_s2 + $0x78] sm:$0xff]  ;;  %v97_v2 = vld [vmem:[%s624_s1 + $0x8] sm:$0xff]  ;;  %v282_v13 = vld [vmem:[%s627_s4] ss:$0 sm:$0xff] }
  0x13   :  { %350 = vmatprep.subr.msk.bf16.mxu0 %vm486_vm1, %v348_v31  ;;  %v366_v58 = vpack.c.bf16 %v89_v55, %v88_v54  ;;  %v91_v0 = vadd.f32 %v75_v60, %v42_v62  ;;  %v92_v9 = vadd.f32 %v76_v5, %v43_v7  ;;  %p396_p4 = pnand %p395_p3, %p389_p0 }
  0x14   :  { %v93_v10 = vadd.f32 %v77_v6, %v44_v8 }
  0x15   :  { %v372_v4 = vpack.c.bf16 %v91_v0, %v90_v63 }
  0x16   :  { %v378_v11 = vpack.c.bf16 %v93_v10, %v92_v9 }
  0x1a   :  { %353 = vmatpush3.bf16.xpose.msk.msra.mxu0 %vm486_vm1, %v348_v31 }
  0x1b   :  { %356 = vmatprep.subr.msk.bf16.mxu0 %vm486_vm1, %v354_v40 }
  0x22   :  { %359 = vmatpush3.bf16.xpose.msk.msra.mxu0 %vm486_vm1, %v354_v40 }
  0x23   :  { %362 = vmatprep.subr.msk.bf16.mxu0 %vm486_vm1, %v360_v49 }
  0x2a   :  { %365 = vmatpush3.bf16.xpose.msk.msra.mxu0 %vm486_vm1, %v360_v49 }
  0x2b   :  { %368 = vmatprep.subr.msk.bf16.mxu0 %vm486_vm1, %v366_v58 }
  0x32   :  { %371 = vmatpush3.bf16.xpose.msk.msra.mxu0 %vm486_vm1, %v366_v58 }
  0x33   :  { %374 = vmatprep.subr.msk.bf16.mxu0 %vm486_vm1, %v372_v4 }
  0x3a   :  { %377 = vmatpush3.bf16.xpose.msk.msra.mxu0 %vm486_vm1, %v372_v4 }
  0x3b   :  { %380 = vmatprep.subr.msk.bf16.mxu0 %vm486_vm1, %v378_v11 }
  0x42   :  { %383 = vmatpush3.bf16.xpose.msk.msra.mxu0 %vm486_vm1, %v378_v11 }
  0x49   :  { %334 = vmatmul.mubr.msk.f32.vlgmr.msra.gmra.mrb[0].mxu0 %vm98_vm0, %v97_v2 }
 0x11c   :  { %v335_v12 = vpop.f32.mrb[0].mxu0 }
 0x11d   :  { %v219_v14 = vpop.f32.mrb[1].mxu0  ;;  %v245_v15 = vadd.f32 %v335_v12, %v282_v13 }
 0x11e   :  { %v244_v16 = vadd.f32 %v282_v13, %v219_v14 }
 0x11f   :  { %247 = vst [vmem:[#allocation3 + $0x8] sm:$0xff] %v245_v15 }
 0x120   :  { %246 = vst [vmem:[#allocation3] sm:$0xff] %v244_v16 }
 0x121   :  { %399 = shalt.err (!%p396_p4)
}
 0x122   :  { %s400_s14 = scalar_lea.hbm %s628_s5, 256 }
 0x123   :  { %p401_p5 = scmp.ne.s32.totalorder %s628_s5, %s400_s14  ;;  %p404_p6 = scmp.lt.u32.totalorder %s400_s14, %s628_s5 }
 0x125   :  { %p406_p7 = pnand %p404_p6, %p401_p5 }
 0x127   :  { %409 = shalt.err (!%p406_p7)
}
 0x128   :  { %s413_s18 = smov 128   ;;  %s414_s19 = smov 8  }
 0x129   :  { %259 = dma.vmem_to_hbm [thread:$0]  %s254_s11, 256, %s628_s5, [#allocation4], %s413_s18, %s413_s18, %s414_s19  }
 0x12a   :  { %410 = dma.done.wait [#allocation4], 256  }
 0x12b   :  { %411 = vsyncadd [#allocation4], 4294967040 }
 0x12c   :  { %263 = vsyncpa [#allocation4], 1 }

</bundles_post_ra>
